<compile_context>
chip_gen: v5e
topology: v5e:2x2
jax: 0.10.0
libtpu: 0.0.40
codegen_flags: <defaults>
</compile_context>

<pallas_src>
import functools

import jax
import jax.numpy as jnp
from jax.experimental import pallas as pl
from jax.experimental.pallas import tpu as pltpu


_LANE = 128
_MiB = 1024 * 1024


@functools.lru_cache(maxsize=None)
def _device_budgets():
    """(block_bytes_target, vmem_limit_bytes), tuned per TPU generation."""
    try:
        vmem_phys = int(pltpu.get_tpu_info().vmem_capacity_bytes)
    except Exception:
        vmem_phys = 64 * _MiB  # conservative default (v7x per-TC VMEM)
    if vmem_phys >= 128 * _MiB:
        # v5e / v6e: 128 MiB physical VMEM; 8 MiB blocks already amortize the
        # ~0.35 us/step overhead at 0.8-1.4 TB/s HBM.
        return 8 * _MiB, 64 * _MiB
    # v7x: 64 MiB/TC but 3.2 TB/s HBM -> larger blocks matter; 2x12 MiB
    # double-buffered blocks + small (gt, ft) tiles fit a 48 MiB limit.
    return 12 * _MiB, 48 * _MiB


def _sublane_pack(dtype):
    # Native sublane packing: 8 rows (f32), 16 (bf16/f16), 32 (int8/fp8).
    return max(8, 32 // jnp.dtype(dtype).itemsize)


# ---------------------------------------------------------------------------
# Kernel
# ---------------------------------------------------------------------------
def _seq_mean_kernel(scale, has_acc, *refs):
    """acc += sum_over_seq(x_chunk); on the last chunk: o = acc_in + acc*scale.

    Grid: (group_tiles, feat_tiles, seq_chunks) -- seq is the reduction axis
    (last, 'arbitrary').  The output block index ignores the seq axis, so the
    f32 scratch accumulator lives across all seq chunks of a (g, f) tile.

    refs:
      [acc_in_ref] (gt, ft)       running sum from previous list entries
      x_ref        (gt, st, ft)   current seq chunk of the current input
      o_ref        (gt, ft)       output tile
      acc          (gt, ft) f32   VMEM scratch accumulator
    """
    if has_acc:
        acc_in_ref, x_ref, o_ref, acc = refs
    else:
        x_ref, o_ref, acc = refs
        acc_in_ref = None

    s = pl.program_id(2)

    @pl.when(s == 0)
    def _init():
        acc[...] = jnp.zeros_like(acc)

    acc[...] += jnp.sum(x_ref[...].astype(jnp.float32), axis=1)

    @pl.when(s == pl.num_programs(2) - 1)
    def _store():
        total = acc[...] * scale          # scale deferred: one mul per tile
        if acc_in_ref is not None:
            total = total + acc_in_ref[...].astype(jnp.float32)
        o_ref[...] = total.astype(o_ref.dtype)


# ---------------------------------------------------------------------------
# Tile selection (8 / 128 aligned, dtype-aware, VMEM-budgeted)
# ---------------------------------------------------------------------------
def _pick_feat_tile(feat_size, gt, itemsize, pack, budget):
    if feat_size % _LANE != 0:
        return feat_size                  # full extent: only legal lane choice
    # Largest lane-multiple divisor of F that still leaves room for at least
    # one native pack of seq rows in the byte budget: longer contiguous HBM
    # runs per DMA element, fewer grid steps, bigger lane-dense stores.
    max_ft = max(_LANE, (budget // (gt * pack * itemsize)) // _LANE * _LANE)
    if feat_size <= max_ft:
        return feat_size
    ft = max_ft
    while ft >= _LANE:
        if feat_size % ft == 0:
            return ft
        ft -= _LANE
    return _LANE


def _maybe_split_for_parallelism(feat_size, ft, gt, g_full):
    # v7x megacore: keep >= 2 steps on the 'parallel' axes so both TCs work.
    if (g_full // gt) * (feat_size // ft) >= 2:
        return ft
    if feat_size % _LANE != 0 or feat_size < 2 * _LANE:
        return ft
    cand = (feat_size // 2) // _LANE * _LANE
    while cand >= _LANE:
        if feat_size % cand == 0:
            return cand
        cand -= _LANE
    return ft


def _pick_seq_tile(seq, gt, ft, itemsize, pack, budget, max_seq_tile=None):
    """Returns (seq_tile, seq_pad).  seq_pad rows of zeros are appended."""
    budget_rows = budget // max(1, gt * ft * itemsize)   # dtype-aware
    if max_seq_tile is not None:
        budget_rows = min(budget_rows, max_seq_tile)
    if seq <= max(budget_rows, pack):
        return seq, 0                     # single full-extent chunk, no pad
    cap = max(pack, (budget_rows // pack) * pack)
    st = cap
    while st >= pack:                     # pack-aligned divisor of S
        if seq % st == 0:
            return st, 0
        st -= pack
    # No pack-aligned divisor: pad S with zero rows (sum unchanged).
    return cap, (-seq) % cap


# ---------------------------------------------------------------------------
# Wrappers
# ---------------------------------------------------------------------------
def _seq_accumulate(x, acc, scale, out_dtype, max_seq_tile=None):
    """One pallas_call computing: out = (acc or 0) + scale * x.sum(axis=1).

    x   : (G, S, F)
    acc : (G, F) float32 running sum from previous inputs, or None
    """
    num_groups, seq, feat_size = x.shape
    itemsize = jnp.dtype(x.dtype).itemsize
    pack = _sublane_pack(x.dtype)
    block_budget, vmem_limit = _device_budgets()

    # Group tiling (output sublane dim: multiple of 8 or full extent).
    pad_g = 0
    if num_groups % 8 == 0:
        gt = 8
    elif num_groups <= 64:
        gt = num_groups                   # small full-extent block is fine
    else:
        pad_g = (-num_groups) % 8         # pad: avoid a huge full-extent tile
        gt = 8
    g_full = num_groups + pad_g

    # Feature tiling (lane dim).
    ft = _pick_feat_tile(feat_size, gt, itemsize, pack, block_budget)
    ft = _maybe_split_for_parallelism(feat_size, ft, gt, g_full)

    # Seq tiling (reduction axis, sublane dim of the 3-D input block).
    st, pad_s = _pick_seq_tile(seq, gt, ft, itemsize, pack, block_budget,
                               max_seq_tile)

    if pad_g or pad_s:
        x = jnp.pad(x, ((0, pad_g), (0, pad_s), (0, 0)))  # zeros: sum unchanged
    if pad_g and acc is not None:
        acc = jnp.pad(acc, ((0, pad_g), (0, 0)))
    s_full = seq + pad_s

    grid = (g_full // gt, feat_size // ft, s_full // st)

    x_spec = pl.BlockSpec((gt, st, ft), lambda g, f, s: (g, s, f))
    gf_spec = pl.BlockSpec((gt, ft), lambda g, f, s: (g, f))

    in_specs = [x_spec]
    operands = [x]
    call_kwargs = {}
    if acc is not None:
        in_specs = [gf_spec, x_spec]
        operands = [acc, x]
        if acc.dtype == out_dtype:
            # Accumulate in place: running-sum buffer reused as the output.
            call_kwargs["input_output_aliases"] = {0: 0}

    # Guard against pathological full-extent fallbacks (non-128-divisible F).
    block_bytes = gt * st * ft * itemsize
    vmem_limit = max(vmem_limit, 3 * block_bytes)

    kernel = functools.partial(_seq_mean_kernel, float(scale), acc is not None)

    out = pl.pallas_call(
        kernel,
        out_shape=jax.ShapeDtypeStruct((g_full, feat_size), out_dtype),
        grid_spec=pltpu.PrefetchScalarGridSpec(
            num_scalar_prefetch=0,
            grid=grid,
            in_specs=in_specs,
            out_specs=gf_spec,
            scratch_shapes=[pltpu.VMEM((gt, ft), jnp.float32)],
        ),
        compiler_params=pltpu.CompilerParams(
            dimension_semantics=("parallel", "parallel", "arbitrary"),
            vmem_limit_bytes=int(vmem_limit),
        ),
        **call_kwargs,
    )(*operands)

    if pad_g:
        out = out[:num_groups]
    return out


def _fused_mean(feats_list, max_seq_tile=None):
    """Mean over the virtual concatenation along dim=1 of all list entries.

    2-D (seq==1) entries are folded with plain jnp adds (XLA fuses them; no
    kernel launch or HBM acc round trip per tiny entry).  3-D entries form a
    chain of per-input Pallas seq reductions, each adding sum(x)/total_rows to
    the running (G, F) f32 sum (aliased in place), so the concat is never
    materialized and only one chunk of one input is VMEM-resident at a time.
    """
    feats2d = [f for f in feats_list if f.ndim == 2]
    feats3d = [f for f in feats_list if f.ndim == 3]
    total_rows = sum(int(f.shape[1]) for f in feats3d) + len(feats2d)
    inv = 1.0 / float(total_rows)
    out_dtype = jnp.result_type(*[f.dtype for f in feats_list])

    acc = None
    if feats2d:
        s2d = feats2d[0].astype(jnp.float32)
        for f in feats2d[1:]:
            s2d = s2d + f.astype(jnp.float32)
        acc = s2d * inv
    if not feats3d:
        return acc.astype(out_dtype)

    for i, f in enumerate(feats3d):
        last = i == len(feats3d) - 1
        acc = _seq_accumulate(
            f, acc, inv,
            out_dtype=out_dtype if last else jnp.float32,
            max_seq_tile=max_seq_tile,
        )
    return acc


class FusionInit:
    """JAX/Pallas port of the PyTorch FusionInit module."""

    def __init__(self, init_type, init_id=None):
        self.init_type = init_type
        self.init_id = init_id

    def __call__(self, in_feats_list, **kwargs):
        if self.init_type == "index":
            init_feats = in_feats_list[self.init_id]
            if init_feats.ndim == 3:
                seq = init_feats.shape[1]
                init_feats = _seq_accumulate(
                    init_feats, None, 1.0 / float(seq),
                    out_dtype=init_feats.dtype)
            return init_feats
        elif self.init_type == "mean":
            return _fused_mean(list(in_feats_list))
        elif self.init_type == "zero":
            # Tiny constant output: let XLA fold/fuse it (a Pallas kernel here
            # is pure launch overhead + an un-fusable HBM write).  float32
            # matches torch.zeros' default dtype in the reference module.
            num_groups = in_feats_list[0].shape[0]
            feat_size = in_feats_list[0].shape[-1]
            return jnp.zeros((num_groups, feat_size), jnp.float32)
        else:
            raise ValueError(
                f"Invalid initialization type in FusionInit module "
                f"(got '{self.init_type}')."
            )


# ---------------------------------------------------------------------------
# Pure-JAX reference (mirrors the PyTorch semantics)
# ---------------------------------------------------------------------------
def _reference(init_type, init_id, in_feats_list):
    if init_type == "index":
        init_feats = in_feats_list[init_id]
        if init_feats.ndim == 3:
            init_feats = init_feats.mean(axis=1)
        return init_feats
    elif init_type == "mean":
        expanded = [f[:, None, :] if f.ndim == 2 else f for f in in_feats_list]
        cat = jnp.concatenate(expanded, axis=1).astype(jnp.float32)
        return cat.mean(axis=1)
    elif init_type == "zero":
        g = in_feats_list[0].shape[0]
        f = in_feats_list[0].shape[-1]
        return jnp.zeros((g, f), jnp.float32)


# ---------------------------------------------------------------------------
# Main
# ---------------------------------------------------------------------------
if __name__ == "__main__":
    num_groups = 16
    feat_size = 256
    seq_a = 24
    seq_b = 8

    key = jax.random.PRNGKey(0)
    k0, k1, k2, k3, k4 = jax.random.split(key, 5)
    # Input list: mix of 3-D and 2-D feature tensors, as the module allows.
    feats_3d_a = jax.random.normal(k0, (num_groups, seq_a, feat_size), jnp.float32)
    feats_2d = jax.random.normal(k1, (num_groups, feat_size), jnp.float32)
    feats_3d_b = jax.random.normal(k2, (num_groups, seq_b, feat_size), jnp.float32)
    in_feats_list = [feats_3d_a, feats_2d, feats_3d_b]

    ok = True

    # 'index' init type (3-D entry -> seq-mean inside the Pallas kernel).
    out_index = jax.block_until_ready(FusionInit("index", init_id=0)(in_feats_list))
    ref_index = _reference("index", 0, in_feats_list)
    ok &= bool(jnp.allclose(out_index, ref_index, atol=1e-5, rtol=1e-5))
    assert out_index.shape == (num_groups, feat_size)

    # 'index' init type (2-D entry -> passthrough, dtype preserved).
    out_index2 = jax.block_until_ready(FusionInit("index", init_id=1)(in_feats_list))
    ok &= bool(jnp.allclose(out_index2, _reference("index", 1, in_feats_list)))

    # 'mean' init type (fused concat + mean; 2-D entries folded in plain JAX).
    out_mean = jax.block_until_ready(FusionInit("mean")(in_feats_list))
    ref_mean = _reference("mean", None, in_feats_list)
    ok &= bool(jnp.allclose(out_mean, ref_mean, atol=1e-5, rtol=1e-5))
    assert out_mean.shape == (num_groups, feat_size)

    # Force small seq chunks -> multi-step reduction axis (exercises the
    # @pl.when init/store accumulator path and the in-place acc chaining).
    out_mean_chunked = jax.block_until_ready(_fused_mean(in_feats_list, max_seq_tile=8))
    ok &= bool(jnp.allclose(out_mean_chunked, ref_mean, atol=1e-5, rtol=1e-5))

    out_idx_chunked = jax.block_until_ready(
        _seq_accumulate(feats_3d_a, None, 1.0 / seq_a,
                        out_dtype=jnp.float32, max_seq_tile=8))
    ok &= bool(jnp.allclose(out_idx_chunked, ref_index, atol=1e-5, rtol=1e-5))

    # bf16 inputs (dtype-aware tiling; f32 accumulation, bf16 output).
    bf16_list = [f.astype(jnp.bfloat16) for f in in_feats_list]
    out_bf16 = jax.block_until_ready(FusionInit("mean")(bf16_list))
    ref_bf16 = _reference("mean", None, bf16_list)
    ok &= bool(jnp.allclose(out_bf16.astype(jnp.float32), ref_bf16,
                            atol=5e-2, rtol=5e-2))

    # Awkward G (>64, not a multiple of 8) -> group-padding path.
    x_g = jax.random.normal(k3, (68, 9, 128), jnp.float32)
    out_g = jax.block_until_ready(
        _seq_accumulate(x_g, None, 1.0 / 9.0, out_dtype=jnp.float32))
    ok &= bool(jnp.allclose(out_g, x_g.mean(axis=1), atol=1e-5, rtol=1e-5))
    assert out_g.shape == (68, 128)

    # Awkward S (no multiple-of-8 divisor under the cap) -> seq-padding path.
    x_s = jax.random.normal(k4, (num_groups, 13, feat_size), jnp.float32)
    out_s = jax.block_until_ready(
        _seq_accumulate(x_s, None, 1.0 / 13.0, out_dtype=jnp.float32,
                        max_seq_tile=8))
    ok &= bool(jnp.allclose(out_s, x_s.mean(axis=1), atol=1e-5, rtol=1e-5))

    # 'zero' init type.
    out_zero = jax.block_until_ready(FusionInit("zero")(in_feats_list))
    ok &= bool(jnp.allclose(out_zero, _reference("zero", None, in_feats_list)))
    assert out_zero.shape == (num_groups, feat_size)

    if ok:
        print("KERNEL_OK")
    else:
        raise SystemExit("mismatch vs reference")
</pallas_src>

<mosaic_0001>
module attributes {stable_mosaic.version = 11 : i64} {
  func.func @_seq_mean_kernel(%arg0: i32, %arg1: i32, %arg2: i32, %arg3: memref<8x24x256xf32, #tpu.memory_space<vmem>>, %arg4: memref<8x256xf32, #tpu.memory_space<vmem>>, %arg5: memref<8x256xf32, #tpu.memory_space<vmem>>) attributes {dimension_semantics = [#tpu.dimension_semantics<parallel>, #tpu.dimension_semantics<parallel>, #tpu.dimension_semantics<arbitrary>], iteration_bounds = array<i64: 2, 1, 1>, scalar_prefetch = 0 : i64, scratch_operands = 1 : i64, tpu.core_type = #tpu.core_type<tc>, window_params = [{transform_indices = @transform_0, window_bounds = array<i64: 8, 24, 256>}, {transform_indices = @transform_1, window_bounds = array<i64: 8, 256>}]} {
    %c0_i32 = arith.constant 0 : i32
    %0 = arith.cmpi eq, %arg2, %c0_i32 : i32
    %1 = arith.extui %0 : i1 to i32
    %c0_i32_0 = arith.constant 0 : i32
    %2 = arith.cmpi ne, %1, %c0_i32_0 : i32
    scf.if %2 {
      %cst_9 = arith.constant 0.000000e+00 : f32
      %11 = vector.broadcast %cst_9 : f32 to vector<8x256xf32>
      %c0_10 = arith.constant 0 : index
      %c0_11 = arith.constant 0 : index
      %12 = vector.load %arg5[%c0_10, %c0_11] : memref<8x256xf32, #tpu.memory_space<vmem>>, vector<8x256xf32>
      tpu.vector_store %arg5[%c0_10, %c0_11], %11 {strides = array<i32>} : memref<8x256xf32, #tpu.memory_space<vmem>>, vector<8x256xf32>,
    } else {
    }
    %c0 = arith.constant 0 : index
    %c0_1 = arith.constant 0 : index
    %3 = vector.load %arg5[%c0, %c0_1] : memref<8x256xf32, #tpu.memory_space<vmem>>, vector<8x256xf32>
    %c0_2 = arith.constant 0 : index
    %c0_3 = arith.constant 0 : index
    %c0_4 = arith.constant 0 : index
    %4 = vector.load %arg3[%c0_2, %c0_3, %c0_4] : memref<8x24x256xf32, #tpu.memory_space<vmem>>, vector<8x24x256xf32>
    %cst = arith.constant dense<0.000000e+00> : vector<8x256xf32>
    %5 = vector.multi_reduction <add>, %4, %cst [1] : vector<8x24x256xf32> to vector<8x256xf32>
    %6 = arith.addf %3, %5 : vector<8x256xf32>
    %c0_5 = arith.constant 0 : index
    %c0_6 = arith.constant 0 : index
    %7 = vector.load %arg5[%c0_5, %c0_6] : memref<8x256xf32, #tpu.memory_space<vmem>>, vector<8x256xf32>
    tpu.vector_store %arg5[%c0_5, %c0_6], %6 {strides = array<i32>} : memref<8x256xf32, #tpu.memory_space<vmem>>, vector<8x256xf32>,
    %c0_i32_7 = arith.constant 0 : i32
    %8 = arith.cmpi eq, %arg2, %c0_i32_7 : i32
    %9 = arith.extui %8 : i1 to i32
    %c0_i32_8 = arith.constant 0 : i32
    %10 = arith.cmpi ne, %9, %c0_i32_8 : i32
    scf.if %10 {
      %c0_9 = arith.constant 0 : index
      %c0_10 = arith.constant 0 : index
      %11 = vector.load %arg5[%c0_9, %c0_10] : memref<8x256xf32, #tpu.memory_space<vmem>>, vector<8x256xf32>
      %cst_11 = arith.constant 0.0416666679 : f32
      %12 = vector.broadcast %cst_11 : f32 to vector<8x256xf32>
      %13 = arith.mulf %11, %12 : vector<8x256xf32>
      %c0_12 = arith.constant 0 : index
      %c0_13 = arith.constant 0 : index
      %14 = vector.load %arg4[%c0_12, %c0_13] : memref<8x256xf32, #tpu.memory_space<vmem>>, vector<8x256xf32>
      tpu.vector_store %arg4[%c0_12, %c0_13], %13 {strides = array<i32>} : memref<8x256xf32, #tpu.memory_space<vmem>>, vector<8x256xf32>,
    } else {
    }
    return
  }
  func.func @transform_0(%arg0: i32, %arg1: i32, %arg2: i32) -> (i32, i32, i32) {
    %c0_i32 = arith.constant 0 : i32
    return %arg0, %arg2, %arg1 : i32, i32, i32
  }
  func.func @transform_1(%arg0: i32, %arg1: i32, %arg2: i32) -> (i32, i32) {
    %c0_i32 = arith.constant 0 : i32
    return %arg0, %arg1 : i32, i32
  }
}

</mosaic_0001>

<bundles_post_ra>
// kernel: tpu_custom_call.1
= control target key start
LH: loop header
LB: loop body
LE: loop exit
PB: predicated region body
PF: predicated region fallthrough
CT: control target
= control target key end

     0   :  { %6 = vsyncpa [#allocation4], 0  ;;  %s916_s0 = inlined_call_operand.hbm [shape: f32[16,24,256], index: 0, kind: input, shape index: {}]   ;;  %s917_s1 = inlined_call_operand.hbm [shape: f32[16,256], index: 1, kind: output, shape index: {}]  }
   0x1   :  { %8 = vsyncpa [#allocation4 + $0x1], 0 }
   0x2   :  { %9 = vsyncpa [#allocation5], 0 }
   0x3   :  { %11 = vsyncpa [#allocation5 + $0x1], 0  ;;  %s724_s6 = smov 0   ;;  %s726_s7 = smov 0  }
   0x4   :  { %s728_s8 = smov 0   ;;  %s730_s9 = smov 0  }
   0x5   :  { %s732_s10 = smov 0   ;;  %s734_s11 = smov 0  }
   0x6 LB: > { %s516_s12 = sadd.s32 4294967295, %s710_s11   ;;  %s517_s13 = sadd.s32 4294967294, %s710_s11   ;;  %s710_s11 = sphi %s734_s11, %s17_s11   ;;  %s706_s10 = sphi %s732_s10, %s926_s10   ;;  %s702_s9 = sphi %s730_s9, %s925_s9   ;;  %s698_s8 = sphi %s728_s8, %s924_s8   ;;  %s694_s7 = sphi %s726_s7, %s923_s7   ;;  %s690_s6 = sphi %s724_s6, %s922_s6  }
   0x7   : > { %s36_s14 = sadd.s32 1, %s706_s10  ;;  %s47_s15 = sadd.s32 1, %s698_s8 }
   0x8   : > { %p38_p0 = scmp.ge.s32.totalorder %s36_s14, 2  ;;  %p54_p1 = scmp.ne.s32.totalorder %s698_s8, %s694_s7 }
   0x9   : > { %p55_p2 = scmp.eq.s32.totalorder %s710_s11, 0  ;;  %p60_p3 = scmp.ne.s32.totalorder %s694_s7, %s690_s6 }
   0xa   : > { %s928_s14 = smov (%p38_p0, %s36_s14), 0  ;;  %p61_p5 = scmp.eq.s32.totalorder %s516_s12, 0 }
   0xb   : > { %p765_p4 = por %p55_p2, %p54_p1  ;;  %s40_s17 = ssub.s32 %s706_s10, %s928_s14 }
   0xc   : > { %p86_p6 = scmp.eq.s32.totalorder %s516_s12, 1  ;;  %p45_p7 = scmp.eq.s32.totalorder %s40_s17, 0 }
   0xd   : > { %p771_p8 = por %p61_p5, %p60_p3  ;;  %p92_p10 = scmp.eq.s32.totalorder %s517_s13, 1 }
   0xe   : > { %p775_p9 = por %p86_p6, %p54_p1  ;;  %p519_p12 = scmp.ge.s32.totalorder %s710_s11, 2 }
   0xf   : > { %s780_s20 = scalar_select %p45_p7, %s698_s8, %s47_s15  }
  0x10   : > { %p782_p11 = por %p92_p10, %p60_p3  ;;  %p546_p13 = scmp.lt.s32.totalorder %s710_s11, 2 }
  0x11   : > { %s112_s22 = sand.u32 1, %s698_s8   ;;  %s532_s24 = smul.u32 384, %s706_s10 }
  0x12   : > { %s531_s23 = smul.u32 384, %s112_s22  ;;  %p539_p0 = pnand %p546_p13, %p765_p4 }
  0x13   : > { %s127_s27 = scalar_lea.hbm %s916_s0, %s532_s24  ;;  %p523_p1 = scmp.ge.s32.totalorder %s710_s11, 1 }
  0x14   : > { %s116_s28 = scalar_lea.vmem [#allocation3], %s531_s23  ;;  %s128_s30 = sshll.u32 %s127_s27, 4  ;;  %s129_s30 = int_to_ptr.hbm [resolvable:$true] %s128_s30 }
  0x15   : > { %s130_s29 = sshll.u32 %s116_s28, 4  ;;  %s113_s2 = scalar_lea.sflag [#allocation4], %s112_s22  ;;  %s131_s29 = int_to_ptr.vmem [resolvable:$true] %s130_s29 }
  0x16   : > { %s712_s3 = smov 256   ;;  %s713_s4 = smov 16  }
  0x17   : > { %541 = dma.hbm_to_vmem [thread:$0]  (!%p539_p0), %s129_s30, 6144, %s131_s29, %s113_s2, %s712_s3, %s712_s3, %s713_s4  }
  0x18   : > { %p138_p2 = scmp.lt.s32.totalorder %s710_s11, 3 }
  0x1a   : > { %p139_p3 = pnand %p523_p1, %p138_p2 }
  0x1b   : > { %s798_s5 = sand.u32 (!%p139_p3), 1, %s694_s7  }
  0x1c   : > { %142 = sbr.rel (%p139_p3) target bundleno = 85 (0x55), region = 24  ;;  %s145_s13 = scalar_lea.sflag (!%p139_p3), [#allocation4], %s798_s5 }
  0x1d   : > { %s533_s12 = smul.u32 (!%p139_p3), 384, %s798_s5 }
  0x1f   : > { %s802_s15 = scalar_lea.vmem (!%p139_p3), [#allocation3], %s533_s12 }
  0x21   : > { %681 = dma.done.wait (%p771_p8), %s145_s13, 6144  }
  0x22   : > { %683 = vsyncadd (%p771_p8), %s145_s13, 4294961152  ;;  %v180_v0 = vld [vmem:[%s802_s15] sm:$0xff]  ;;  %v182_v1 = vld [vmem:[%s802_s15 + $0x10] sm:$0xff]  ;;  %vm372_vm0 = vcmask 1041409   ;;  %vm374_vm1 = vcmask 1042434   ;;  %vm376_vm2 = vcmask 1043459  }
  0x23   : > { %v184_v2 = vld [vmem:[%s802_s15 + $0x20] sm:$0xff]  ;;  %v186_v3 = vld [vmem:[%s802_s15 + $0x30] sm:$0xff]  ;;  %v228_v6 = vadd.f32 %v182_v1, %v180_v0  ;;  %vm378_vm3 = vcmask 1044484   ;;  %vm380_vm4 = vcmask 1045509   ;;  %vm382_vm5 = vcmask 1046534   ;;  %s524_s16 = sshll.u32 %s798_s5, 4 }
  0x24   : > { %v188_v4 = vld [vmem:[%s802_s15 + $0x40] sm:$0xff]  ;;  %v190_v5 = vld [vmem:[%s802_s15 + $0x50] sm:$0xff]  ;;  %vm384_vm6 = vcmask 1047559   ;;  %s866_s17 = scalar_lea.vmem [#allocation6], %s524_s16  ;;  %s530_s18 = sshll.u32 %s702_s9, 4 }
  0x25   : > { %v192_v7 = vld [vmem:[%s802_s15 + $0x60] sm:$0xff]  ;;  %v194_v8 = vld [vmem:[%s802_s15 + $0x70] sm:$0xff]  ;;  %v244_v10 = vadd.f32 %v188_v4, %v186_v3  ;;  %v229_v14 = vadd.f32 %v228_v6, %v184_v2  ;;  %v181_v4 = vld [vmem:[%s802_s15 + $0x8] sm:$0xff]  ;;  %s422_s9 = scalar_lea.hbm %s917_s1, %s530_s18  ;;  %s424_s24 = sshll.u32 %s866_s17, 4  ;;  %s425_s24 = int_to_ptr.vmem [resolvable:$true] %s424_s24 }
  0x26   : > { %v196_v9 = vld [vmem:[%s802_s15 + $0x80] sm:$0xff]  ;;  %v198_v11 = vld [vmem:[%s802_s15 + $0x90] sm:$0xff]  ;;  %v260_v15 = vadd.f32 %v194_v8, %v192_v7  ;;  %s426_s25 = sshll.u32 %s422_s9, 4  ;;  %s409_s26 = scalar_lea.sflag [#allocation5], %s798_s5  ;;  %s427_s25 = int_to_ptr.hbm [resolvable:$true] %s426_s25 }
  0x27   : > { %v200_v12 = vld [vmem:[%s802_s15 + $0xa0] sm:$0xff]  ;;  %v202_v13 = vld [vmem:[%s802_s15 + $0xb0] sm:$0xff]  ;;  %v245_v19 = vadd.f32 %v244_v10, %v190_v5  ;;  %v230_v24 = vrot.slane %v229_v14, 4  ;;  %v183_v5 = vld [vmem:[%s802_s15 + $0x18] sm:$0xff]  ;;  %s642_s27 = sshra.s32 %s427_s25, 4  ;;  %s648_s2 = scalar_lea.hbm %s917_s1, 32  ;;  %s643_s27 = int_to_ptr.hbm [resolvable:$true] %s642_s27 }
  0x28   : > { %v204_v16 = vld [vmem:[%s802_s15 + $0xc0] sm:$0xff]  ;;  %v206_v17 = vld [vmem:[%s802_s15 + $0xd0] sm:$0xff]  ;;  %v276_v20 = vadd.f32 %v200_v12, %v198_v11  ;;  %v261_v25 = vadd.f32 %v260_v15, %v196_v9  ;;  %s644_s28 = scalar_lea.hbm %s643_s27, 16  ;;  %p649_p7 = scmp.lt.s32.totalorder %s643_s27, %s917_s1 }
  0x29   : > { %v208_v18 = vld [vmem:[%s802_s15 + $0xe0] sm:$0xff]  ;;  %v210_v21 = vld [vmem:[%s802_s15 + $0xf0] sm:$0xff]  ;;  %v292_v26 = vadd.f32 %v206_v17, %v204_v16  ;;  %v246_v30 = vrot.slane %v245_v19, 4  ;;  %v231_v36 = vadd.f32 %v230_v24, %v229_v14  ;;  %v185_v14 = vld [vmem:[%s802_s15 + $0x28] sm:$0xff]  ;;  %p645_p4 = scmp.ne.s32.totalorder %s643_s27, %s644_s28  ;;  %p650_p8 = scmp.lt.s32.totalorder %s648_s2, %s644_s28 }
  0x2a   : > { %v212_v22 = vld [vmem:[%s802_s15 + $0x100] sm:$0xff]  ;;  %v214_v23 = vld [vmem:[%s802_s15 + $0x110] sm:$0xff]  ;;  %v277_v31 = vadd.f32 %v276_v20, %v202_v13  ;;  %v262_v37 = vrot.slane %v261_v25, 4  ;;  %v236_v20 = vadd.f32 %v183_v5, %v181_v4 }
  0x2b   : > { %v216_v27 = vld [vmem:[%s802_s15 + $0x120] sm:$0xff]  ;;  %v218_v28 = vld [vmem:[%s802_s15 + $0x130] sm:$0xff]  ;;  %v308_v32 = vadd.f32 %v212_v22, %v210_v21  ;;  %v293_v38 = vadd.f32 %v292_v26, %v208_v18  ;;  %v247_v40 = vadd.f32 %v246_v30, %v245_v19  ;;  %v232_v44 = vrot.slane %v231_v36, 2  ;;  %v187_v18 = vld [vmem:[%s802_s15 + $0x38] sm:$0xff]  ;;  %p646_p5 = pnand %p645_p4, %p775_p9  ;;  %p651_p10 = por %p650_p8, %p649_p7 }
  0x2c   : > { %v220_v29 = vld [vmem:[%s802_s15 + $0x140] sm:$0xff]  ;;  %v222_v33 = vld [vmem:[%s802_s15 + $0x150] sm:$0xff]  ;;  %v324_v39 = vadd.f32 %v218_v28, %v216_v27  ;;  %v278_v41 = vrot.slane %v277_v31, 4  ;;  %v263_v45 = vadd.f32 %v262_v37, %v261_v25  ;;  %v189_v19 = vld [vmem:[%s802_s15 + $0x48] sm:$0xff] }
  0x2d   : > { %v224_v34 = vld [vmem:[%s802_s15 + $0x160] sm:$0xff]  ;;  %v226_v35 = vld [vmem:[%s802_s15 + $0x170] sm:$0xff]  ;;  %v309_v42 = vadd.f32 %v308_v32, %v214_v23  ;;  %v294_v46 = vrot.slane %v293_v38, 4  ;;  %v248_v48 = vrot.slane %v247_v40, 2  ;;  %v233_v52 = vadd.f32 %v232_v44, %v231_v36  ;;  %v193_v25 = vld [vmem:[%s802_s15 + $0x68] sm:$0xff]  ;;  %p647_p6 = pneg %p646_p5 }
  0x2e   : > { %v340_v43 = vadd.f32 %v224_v34, %v222_v33  ;;  %v325_v47 = vadd.f32 %v324_v39, %v220_v29  ;;  %v279_v49 = vadd.f32 %v278_v41, %v277_v31  ;;  %v264_v53 = vrot.slane %v263_v45, 2  ;;  %v195_v26 = vld [vmem:[%s802_s15 + $0x78] sm:$0xff]  ;;  %v201_v32 = vld [vmem:[%s802_s15 + $0xa8] sm:$0xff] }
  0x2f   : > { %v310_v50 = vrot.slane %v309_v42, 4  ;;  %v295_v54 = vadd.f32 %v294_v46, %v293_v38  ;;  %v249_v56 = vadd.f32 %v248_v48, %v247_v40  ;;  %v234_v60 = vrot.slane %v233_v52, 1  ;;  %v191_v30 = vld [vmem:[%s802_s15 + $0x58] sm:$0xff]  ;;  %v197_v37 = vld [vmem:[%s802_s15 + $0x88] sm:$0xff]  ;;  %p652_p13 = pnand %p651_p10, %p647_p6 }
  0x30   : > { %v341_v51 = vadd.f32 %v340_v43, %v226_v35  ;;  %v326_v55 = vrot.slane %v325_v47, 4  ;;  %v280_v57 = vrot.slane %v279_v49, 2  ;;  %v265_v61 = vadd.f32 %v264_v53, %v263_v45  ;;  %v199_v31 = vld [vmem:[%s802_s15 + $0x98] sm:$0xff]  ;;  %v205_v38 = vld [vmem:[%s802_s15 + $0xc8] sm:$0xff] }
  0x31   : > { %v311_v58 = vadd.f32 %v310_v50, %v309_v42  ;;  %v296_v62 = vrot.slane %v295_v54, 2  ;;  %v250_v0 = vrot.slane %v249_v56, 1  ;;  %v235_v6 = vadd.f32 %v234_v60, %v233_v52  ;;  %v207_v39 = vld [vmem:[%s802_s15 + $0xd8] sm:$0xff]  ;;  %v213_v45 = vld [vmem:[%s802_s15 + $0x108] sm:$0xff] }
  0x32   : > { %v342_v59 = vrot.slane %v341_v51, 4  ;;  %v327_v63 = vadd.f32 %v326_v55, %v325_v47  ;;  %v281_v1 = vadd.f32 %v280_v57, %v279_v49  ;;  %v266_v7 = vrot.slane %v265_v61, 1  ;;  %v203_v43 = vld [vmem:[%s802_s15 + $0xb8] sm:$0xff]  ;;  %v209_v50 = vld [vmem:[%s802_s15 + $0xe8] sm:$0xff] }
  0x33   : > { %v312_v2 = vrot.slane %v311_v58, 2  ;;  %v297_v8 = vadd.f32 %v296_v62, %v295_v54  ;;  %v251_v10 = vadd.f32 %v250_v0, %v249_v56  ;;  %v237_v33 = vadd.f32 %v236_v20, %v185_v14  ;;  %v211_v44 = vld [vmem:[%s802_s15 + $0xf8] sm:$0xff]  ;;  %v217_v55 = vld [vmem:[%s802_s15 + $0x128] sm:$0xff] }
  0x34   : > { %v343_v3 = vadd.f32 %v342_v59, %v341_v51  ;;  %v328_v9 = vrot.slane %v327_v63, 2  ;;  %v282_v11 = vrot.slane %v281_v1, 1  ;;  %v267_v15 = vadd.f32 %v266_v7, %v265_v61  ;;  %v215_v54 = vld [vmem:[%s802_s15 + $0x118] sm:$0xff]  ;;  %v225_v62 = vld [vmem:[%s802_s15 + $0x168] sm:$0xff] }
  0x35   : > { %v313_v12 = vadd.f32 %v312_v2, %v311_v58  ;;  %v298_v16 = vrot.slane %v297_v8, 1  ;;  %v373_v24 = vsel %vm372_vm0, %v251_v10, %v235_v6  ;;  %v252_v40 = vadd.f32 %v189_v19, %v187_v18  ;;  %v219_v56 = vld [vmem:[%s802_s15 + $0x138] sm:$0xff] }
  0x36   : > { %v344_v13 = vrot.slane %v343_v3, 2  ;;  %v329_v17 = vadd.f32 %v328_v9, %v327_v63  ;;  %v283_v21 = vadd.f32 %v282_v11, %v281_v1  ;;  %v375_v29 = vsel %vm374_vm1, %v267_v15, %v373_v24  ;;  %v223_v61 = vld [vmem:[%s802_s15 + $0x158] sm:$0xff] }
  0x37   : > { %v314_v22 = vrot.slane %v313_v12, 1  ;;  %v299_v27 = vadd.f32 %v298_v16, %v297_v8  ;;  %v238_v46 = vrot.slane %v237_v33, 4  ;;  %v268_v47 = vadd.f32 %v195_v26, %v193_v25  ;;  %v227_v7 = vld [vmem:[%s802_s15 + $0x178] sm:$0xff] }
  0x38   : > { %v345_v23 = vadd.f32 %v344_v13, %v343_v3  ;;  %v330_v28 = vrot.slane %v329_v17, 1  ;;  %v377_v36 = vsel %vm376_vm2, %v283_v21, %v375_v29  ;;  %v253_v51 = vadd.f32 %v252_v40, %v191_v30  ;;  %v221_v3 = vld [vmem:[%s802_s15 + $0x148] sm:$0xff] }
  0x39   : > { %v315_v34 = vadd.f32 %v314_v22, %v313_v12  ;;  %v379_v42 = vsel %vm378_vm3, %v299_v27, %v377_v36  ;;  %v284_v52 = vadd.f32 %v201_v32, %v199_v31  ;;  %v239_v57 = vadd.f32 %v238_v46, %v237_v33 }
  0x3a   : > { %v346_v35 = vrot.slane %v345_v23, 1  ;;  %v331_v41 = vadd.f32 %v330_v28, %v329_v17  ;;  %v269_v58 = vadd.f32 %v268_v47, %v197_v37  ;;  %v300_v59 = vadd.f32 %v207_v39, %v205_v38 }
  0x3b   : > { %v381_v49 = vsel %vm380_vm4, %v315_v34, %v379_v42  ;;  %v254_v63 = vrot.slane %v253_v51, 4  ;;  %v285_v0 = vadd.f32 %v284_v52, %v203_v43  ;;  %v316_v1 = vadd.f32 %v213_v45, %v211_v44 }
  0x3c   : > { %v347_v48 = vadd.f32 %v346_v35, %v345_v23  ;;  %v383_v53 = vsel %vm382_vm5, %v331_v41, %v381_v49  ;;  %v240_v4 = vrot.slane %v239_v57, 2  ;;  %v270_v5 = vrot.slane %v269_v58, 4 }
  0x3d   : > { %v301_v6 = vadd.f32 %v300_v59, %v209_v50  ;;  %v255_v8 = vadd.f32 %v254_v63, %v253_v51  ;;  %v286_v9 = vrot.slane %v285_v0, 4  ;;  %v317_v10 = vadd.f32 %v316_v1, %v215_v54 }
  0x3e   : > { %v385_v60 = vsel %vm384_vm6, %v347_v48, %v383_v53  ;;  %v332_v11 = vadd.f32 %v219_v56, %v217_v55  ;;  %v241_v12 = vadd.f32 %v240_v4, %v239_v57  ;;  %v271_v13 = vadd.f32 %v270_v5, %v269_v58 }
  0x3f   : > { %v404_v2 = vmul.f32 0.041666668, %v385_v60  ;;  %v302_v14 = vrot.slane %v301_v6, 4  ;;  %v348_v15 = vadd.f32 %v225_v62, %v223_v61  ;;  %v256_v16 = vrot.slane %v255_v8, 2 }
  0x40   : > { %v287_v17 = vadd.f32 %v286_v9, %v285_v0  ;;  %v318_v18 = vrot.slane %v317_v10, 4  ;;  %v333_v19 = vadd.f32 %v332_v11, %v221_v3  ;;  %v242_v20 = vrot.slane %v241_v12, 1 }
  0x41   : > { %406 = vst [vmem:[%s866_s17] sm:$0xff] %v404_v2  ;;  %v272_v21 = vrot.slane %v271_v13, 2  ;;  %v303_v22 = vadd.f32 %v302_v14, %v301_v6  ;;  %v349_v23 = vadd.f32 %v348_v15, %v227_v7  ;;  %v257_v24 = vadd.f32 %v256_v16, %v255_v8 }
  0x42   : > { %v288_v25 = vrot.slane %v287_v17, 2  ;;  %v319_v26 = vadd.f32 %v318_v18, %v317_v10  ;;  %v334_v27 = vrot.slane %v333_v19, 4  ;;  %v243_v28 = vadd.f32 %v242_v20, %v241_v12 }
  0x43   : > { %v273_v29 = vadd.f32 %v272_v21, %v271_v13  ;;  %v304_v30 = vrot.slane %v303_v22, 2  ;;  %v350_v31 = vrot.slane %v349_v23, 4  ;;  %v258_v32 = vrot.slane %v257_v24, 1 }
  0x44   : > { %v289_v33 = vadd.f32 %v288_v25, %v287_v17  ;;  %v320_v34 = vrot.slane %v319_v26, 2  ;;  %v335_v35 = vadd.f32 %v334_v27, %v333_v19 }
  0x45   : > { %v274_v36 = vrot.slane %v273_v29, 1  ;;  %v305_v37 = vadd.f32 %v304_v30, %v303_v22  ;;  %v351_v38 = vadd.f32 %v350_v31, %v349_v23  ;;  %v259_v39 = vadd.f32 %v258_v32, %v257_v24 }
  0x46   : > { %v290_v40 = vrot.slane %v289_v33, 1  ;;  %v321_v41 = vadd.f32 %v320_v34, %v319_v26  ;;  %v336_v42 = vrot.slane %v335_v35, 2 }
  0x47   : > { %v275_v43 = vadd.f32 %v274_v36, %v273_v29  ;;  %v306_v44 = vrot.slane %v305_v37, 1  ;;  %v352_v45 = vrot.slane %v351_v38, 2  ;;  %v386_v49 = vsel %vm372_vm0, %v259_v39, %v243_v28 }
  0x48   : > { %v291_v46 = vadd.f32 %v290_v40, %v289_v33  ;;  %v322_v47 = vrot.slane %v321_v41, 1  ;;  %v337_v48 = vadd.f32 %v336_v42, %v335_v35 }
  0x49   : > { %v307_v50 = vadd.f32 %v306_v44, %v305_v37  ;;  %v353_v51 = vadd.f32 %v352_v45, %v351_v38  ;;  %v387_v52 = vsel %vm374_vm1, %v275_v43, %v386_v49 }
  0x4a   : > { %v323_v53 = vadd.f32 %v322_v47, %v321_v41  ;;  %v338_v54 = vrot.slane %v337_v48, 1  ;;  %v388_v55 = vsel %vm376_vm2, %v291_v46, %v387_v52 }
  0x4b   : > { %v354_v56 = vrot.slane %v353_v51, 1  ;;  %v389_v57 = vsel %vm378_vm3, %v307_v50, %v388_v55 }
  0x4c   : > { %v339_v58 = vadd.f32 %v338_v54, %v337_v48  ;;  %v390_v59 = vsel %vm380_vm4, %v323_v53, %v389_v57 }
  0x4d   : > { %v355_v60 = vadd.f32 %v354_v56, %v353_v51 }
  0x4e   : > { %v391_v61 = vsel %vm382_vm5, %v339_v58, %v390_v59 }
  0x4f   : > { %v392_v62 = vsel %vm384_vm6, %v355_v60, %v391_v61 }
  0x50   : > { %v405_v63 = vmul.f32 0.041666668, %v392_v62 }
  0x52   : > { %407 = vst [vmem:[%s866_s17 + $0x8] sm:$0xff] %v405_v63 }
  0x53   : > { %655 = shalt.err (!%p652_p13)
}
  0x54   : > { %536 = dma.vmem_to_hbm [thread:$0]  (%p775_p9), %s425_s24, 256, %s427_s25, %s409_s26  }
  0x55 PF: > { %s438_s5 = sand.u32 1, %s690_s6   ;;  %p543_p0 = pnand %p519_p12, %p782_p11 }
  0x56   : > { %s439_s12 = scalar_lea.sflag [#allocation5], %s438_s5 }
  0x57   : > { %p544_p1 = pneg %p543_p0 }
  0x59   : > { %685 = dma.done.wait (%p544_p1), %s439_s12, 256  }
  0x5a   : > { %687 = vsyncadd (%p544_p1), %s439_s12, 4294967040  ;;  %s17_s11 = sadd.s32 1, %s710_s11   ;;  %s922_s6 = smov %s694_s7 }
  0x5b   : > { %p14_p2 = scmp.ge.s32.totalorder %s17_s11, 4   ;;  %s923_s7 = smov %s698_s8 }
  0x5c   : > { %s924_s8 = smov %s780_s20  ;;  %s925_s9 = smov %s706_s10 }
  0x5d   : > { %s926_s10 = smov %s928_s14  ;;  %16 = sbr.rel (!%p14_p2) target bundleno = 6 (0x6), region = 77 }
  0x62   :  { %445 = vsyncpa [#allocation4], 1 }
  0x63   :  { %447 = vsyncpa [#allocation4 + $0x1], 1 }
  0x64   :  { %448 = vsyncpa [#allocation5], 1 }
  0x65   :  { %450 = vsyncpa [#allocation5 + $0x1], 1 }

</bundles_post_ra>
